<compile_context>
chip_gen: v5e
topology: v5e:2x2
jax: 0.10.0
libtpu: 0.0.40
codegen_flags: <defaults>
</compile_context>

<pallas_src>
import functools

import jax
import jax.numpy as jnp
from jax.experimental import pallas as pl
from jax.experimental.pallas import tpu as pltpu


def _focal_loss_kernel(logits_ref, targets_ref, out_ref, acc_ref, *,
                       gamma, n_valid, tile_n, tiles_per_core):
    c = pl.program_id(0)          # core axis ("parallel")
    t = pl.program_id(1)          # batch-tile axis ("arbitrary", reduction)
    n_t = pl.num_programs(1)

    # init this core's resident per-row accumulator
    @pl.when(t == 0)
    def _():
        acc_ref[...] = jnp.zeros_like(acc_ref)

    logits = logits_ref[...].astype(jnp.float32)            # [TN, C] f32 compute
    tgt = targets_ref[...]                                   # [TN, 1] int32

    # gather logits[target] with a select on the raw logits (no one-hot f32 mul)
    class_ids = jax.lax.broadcasted_iota(jnp.int32, logits.shape, 1)   # [TN, C]
    tgt_logit = jnp.sum(jnp.where(class_ids == tgt, logits, 0.0),
                        axis=-1, keepdims=True)              # [TN, 1]

    # log-sum-exp over the class (lane) axis; shifted->exp->sum is single-use
    m = jnp.max(logits, axis=-1, keepdims=True)               # [TN, 1]
    sumexp = jnp.sum(jnp.exp(logits - m), axis=-1, keepdims=True)
    lse = jnp.log(sumexp)                                      # [TN, 1]

    # ce = -log_softmax[target]; clamp tiny ULP-negative roundoff at 0
    ce = jnp.maximum(lse - (tgt_logit - m), 0.0)               # [TN, 1]

    # focal modulation: (1 - p_t)^gamma * ce
    p_t = jnp.exp(-ce)
    u = jnp.maximum(1.0 - p_t, 0.0)
    g = float(gamma)
    if g == 2.0:
        mod = u * u                                            # VPU mul, no EUP pow
    elif g == 1.0:
        mod = u
    elif g == 0.0:
        mod = jnp.ones_like(u)
    elif g.is_integer() and 0.0 < g <= 8.0:
        mod = u
        for _ in range(int(g) - 1):
            mod = mod * u
    else:
        mod = u ** g
    loss = mod * ce                                            # [TN, 1]

    # mask rows past the true N (remainder tile + clamped overflow grid steps);
    # keep this a select, not a multiply (garbage rows may hold inf/NaN).
    tile_idx = c * tiles_per_core + t
    row_ids = tile_idx * tile_n + jax.lax.broadcasted_iota(jnp.int32, loss.shape, 0)
    loss = jnp.where(row_ids < n_valid, loss, 0.0)

    # pure-VPU per-row accumulate; no cross-sublane reduce / RMW store per step
    acc_ref[...] += loss

    # finalize this core: one sublane reduce + one output-block store
    @pl.when(t == n_t - 1)
    def _():
        out_ref[...] = jnp.zeros_like(out_ref) + jnp.sum(acc_ref[...])


def _vmem_budget_bytes():
    """(working-set budget, vmem_limit_bytes) derived from chip VMEM capacity."""
    cap = 64 * 1024 * 1024                     # conservative fallback: v7x per-TC
    try:
        info = pltpu.get_tpu_info()
        for attr in ("vmem_capacity_bytes", "vmem_bytes", "vmem_size_bytes"):
            v = getattr(info, attr, None)
            if v:
                cap = int(v)
                break
    except Exception:
        pass
    limit = min(int(cap * 3) // 4, 96 * 1024 * 1024)   # 96 MiB on 128 MiB parts, 48 MiB on v7x
    budget = int(limit * 0.55)                          # headroom for Mosaic scratch/spills
    return budget, limit


def _pick_tile_n(n, c, itemsize, budget_bytes):
    """Largest batch tile whose full working set fits the VMEM budget.

    Per-row bytes accounted:
      * 2x double-buffered streamed logits block     (2 * C * itemsize)
      * live [TN, C] f32 temporaries (select, exp)   (~3 * C * 4)
      * lane-padded [TN, 1] columns: 2x targets buf, per-row acc scratch,
        and live f32 row-stat temps                   (~8 * 512)
    """
    granule = 8 * max(1, 4 // itemsize)        # 8 rows f32, 16 bf16, 32 int8/fp8
    per_row = 2 * c * itemsize + 3 * c * 4 + 8 * 512
    tn = budget_bytes // per_row
    tn = min(tn, 8192)                          # amortizes ~0.35us/step; bounds column temps
    tn = max(granule, (tn // granule) * granule)
    if tn >= n:
        return n                                # single full block (block == full dims ok)
    return tn


def focal_loss(logits, targets, *, gamma=2.0, tile_n=None, num_cores=None):
    """Pallas TPU FocalLoss(gamma, weight=None, sample_weight=None, reduction='mean')."""
    N, C = logits.shape
    # NOTE: logits stream in their HBM dtype (bf16 halves the memory-bound
    # stream); the upcast to f32 happens inside the kernel tile.
    targets2d = targets.reshape(N, 1).astype(jnp.int32)
    itemsize = jnp.dtype(logits.dtype).itemsize

    budget, vmem_limit = _vmem_budget_bytes()
    if tile_n is None:
        tile_n = _pick_tile_n(N, C, itemsize, budget)
    tile_n = min(tile_n, N)
    if tile_n != N and tile_n % 8 != 0:
        raise ValueError("tile_n must be a multiple of 8 or equal to N")

    total_tiles = pl.cdiv(N, tile_n)
    if num_cores is None:
        num_cores = 2 if total_tiles >= 2 else 1     # use both TCs on v7x
    num_cores = max(1, min(num_cores, total_tiles))
    tiles_per_core = pl.cdiv(total_tiles, num_cores)
    grid = (num_cores, tiles_per_core)

    def row_block(c_idx, t_idx):
        # clamp overflow grid steps onto the last valid tile (rows get masked)
        return jnp.minimum(c_idx * tiles_per_core + t_idx, total_tiles - 1)

    cost = pl.CostEstimate(
        flops=8 * N * C + 16 * N,
        transcendentals=N * C + 3 * N,
        bytes_accessed=N * C * itemsize + N * 4 + num_cores * 8 * 128 * 4,
    )

    out = pl.pallas_call(
        functools.partial(_focal_loss_kernel, gamma=gamma, n_valid=N,
                          tile_n=tile_n, tiles_per_core=tiles_per_core),
        out_shape=jax.ShapeDtypeStruct((num_cores, 8, 128), jnp.float32),
        grid=grid,
        in_specs=[
            # logits: (tile_n, C) blocks streamed (double-buffered) over batch
            pl.BlockSpec((tile_n, C), lambda c, t: (row_block(c, t), 0)),
            # targets: (tile_n, 1) int32 column (lane-padded; budgeted above)
            pl.BlockSpec((tile_n, 1), lambda c, t: (row_block(c, t), 0)),
        ],
        # one (8,128) partial-sum block per core, written once at that core's end
        out_specs=pl.BlockSpec((1, 8, 128), lambda c, t: (c, 0, 0)),
        scratch_shapes=[pltpu.VMEM((tile_n, 1), jnp.float32)],   # per-core row acc
        compiler_params=pltpu.CompilerParams(
            dimension_semantics=("parallel", "arbitrary"),
            vmem_limit_bytes=vmem_limit),
        cost_estimate=cost,
    )(logits, targets2d)

    # combine the per-core partials and apply reduction='mean' over the true N
    return jnp.sum(out[:, 0, 0]) / N


def _focal_loss_ref(logits, targets, gamma=2.0):
    """Pure-JAX reference matching torch semantics."""
    logp = jax.nn.log_softmax(logits.astype(jnp.float32), axis=-1)
    ce = -jnp.take_along_axis(logp, targets[:, None].astype(jnp.int32), axis=-1)[:, 0]
    p_t = jnp.exp(-ce)
    return jnp.mean((1.0 - p_t) ** gamma * ce)


if __name__ == "__main__":
    key = jax.random.PRNGKey(0)
    k1, k2, k3, k4, k5, k6 = jax.random.split(key, 6)

    # case 1: small shape matching the module's (N, C) convention, single block
    N, C = 8, 32
    logits = jax.random.normal(k1, (N, C), dtype=jnp.float32)
    targets = jax.random.randint(k2, (N,), 0, C, dtype=jnp.int32)
    out = jax.block_until_ready(focal_loss(logits, targets, gamma=2.0))
    ref = _focal_loss_ref(logits, targets, gamma=2.0)
    assert jnp.allclose(out, ref, atol=1e-5, rtol=1e-5), (out, ref)

    # case 2: multi-tile streaming + 2-core split + remainder-row masking
    N2, C2 = 20, 32
    logits2 = jax.random.normal(k3, (N2, C2), dtype=jnp.float32)
    targets2 = jax.random.randint(k4, (N2,), 0, C2, dtype=jnp.int32)
    out2 = jax.block_until_ready(focal_loss(logits2, targets2, gamma=2.0, tile_n=8))
    ref2 = _focal_loss_ref(logits2, targets2, gamma=2.0)
    assert jnp.allclose(out2, ref2, atol=1e-5, rtol=1e-5), (out2, ref2)

    # case 3: bf16 logits streamed in bf16, 16-row granule, 2-core split
    N3, C3 = 48, 32
    logits3 = jax.random.normal(k5, (N3, C3), dtype=jnp.bfloat16)
    targets3 = jax.random.randint(k6, (N3,), 0, C3, dtype=jnp.int32)
    out3 = jax.block_until_ready(focal_loss(logits3, targets3, gamma=2.0, tile_n=16))
    ref3 = _focal_loss_ref(logits3, targets3, gamma=2.0)
    assert jnp.allclose(out3, ref3, atol=1e-4, rtol=1e-4), (out3, ref3)

    print("KERNEL_OK")
</pallas_src>

<mosaic_0001>
module attributes {stable_mosaic.version = 11 : i64} {
  func.func @_focal_loss_kernel(%arg0: i32, %arg1: i32, %arg2: memref<8x32xf32, #tpu.memory_space<vmem>>, %arg3: memref<8x1xi32, #tpu.memory_space<vmem>>, %arg4: memref<1x8x128xf32, #tpu.memory_space<vmem>>, %arg5: memref<8x1xf32, #tpu.memory_space<vmem>>) attributes {dimension_semantics = [#tpu.dimension_semantics<parallel>, #tpu.dimension_semantics<arbitrary>], iteration_bounds = array<i64: 1, 1>, scalar_prefetch = 0 : i64, scratch_operands = 1 : i64, tpu.core_type = #tpu.core_type<tc>, window_params = [{transform_indices = @transform_0, window_bounds = array<i64: 8, 32>}, {transform_indices = @transform_1, window_bounds = array<i64: 8, 1>}, {transform_indices = @transform_2, window_bounds = array<i64: 1, 8, 128>}]} {
    %c0_i32 = arith.constant 0 : i32
    %0 = arith.cmpi eq, %arg1, %c0_i32 : i32
    %1 = arith.extui %0 : i1 to i32
    %c0_i32_0 = arith.constant 0 : i32
    %2 = arith.cmpi ne, %1, %c0_i32_0 : i32
    scf.if %2 {
      %cst_19 = arith.constant 0.000000e+00 : f32
      %49 = vector.broadcast %cst_19 : f32 to vector<8x1xf32>
      %c0_20 = arith.constant 0 : index
      %c0_21 = arith.constant 0 : index
      %50 = vector.load %arg5[%c0_20, %c0_21] : memref<8x1xf32, #tpu.memory_space<vmem>>, vector<8x1xf32>
      tpu.vector_store %arg5[%c0_20, %c0_21], %49 {strides = array<i32>} : memref<8x1xf32, #tpu.memory_space<vmem>>, vector<8x1xf32>,
    } else {
    }
    %c0 = arith.constant 0 : index
    %c0_1 = arith.constant 0 : index
    %3 = vector.load %arg2[%c0, %c0_1] : memref<8x32xf32, #tpu.memory_space<vmem>>, vector<8x32xf32>
    %c0_2 = arith.constant 0 : index
    %c0_3 = arith.constant 0 : index
    %4 = vector.load %arg3[%c0_2, %c0_3] : memref<8x1xi32, #tpu.memory_space<vmem>>, vector<8x1xi32>
    %5 = tpu.iota {dimensions = array<i32: 1>} : vector<8x32xi32>
    %6 = vector.broadcast %4 : vector<8x1xi32> to vector<8x32xi32>
    %7 = arith.cmpi eq, %5, %6 : vector<8x32xi32>
    %cst = arith.constant 0.000000e+00 : f32
    %8 = vector.broadcast %cst : f32 to vector<8x32xf32>
    %9 = arith.select %7, %3, %8 : vector<8x32xi1>, vector<8x32xf32>
    %cst_4 = arith.constant dense<0.000000e+00> : vector<8xf32>
    %10 = vector.multi_reduction <add>, %9, %cst_4 [1] : vector<8x32xf32> to vector<8xf32>
    %11 = vector.shape_cast %10 : vector<8xf32> to vector<8x1xf32>
    %cst_5 = arith.constant dense<0xFF800000> : vector<8xf32>
    %12 = vector.multi_reduction <maximumf>, %3, %cst_5 [1] : vector<8x32xf32> to vector<8xf32>
    %13 = vector.shape_cast %12 : vector<8xf32> to vector<8x1xf32>
    %14 = vector.broadcast %13 : vector<8x1xf32> to vector<8x32xf32>
    %15 = arith.subf %3, %14 : vector<8x32xf32>
    %16 = math.exp %15 : vector<8x32xf32>
    %cst_6 = arith.constant dense<0.000000e+00> : vector<8xf32>
    %17 = vector.multi_reduction <add>, %16, %cst_6 [1] : vector<8x32xf32> to vector<8xf32>
    %18 = vector.shape_cast %17 : vector<8xf32> to vector<8x1xf32>
    %19 = math.log %18 : vector<8x1xf32>
    %20 = arith.subf %11, %13 : vector<8x1xf32>
    %21 = arith.subf %19, %20 : vector<8x1xf32>
    %cst_7 = arith.constant 0.000000e+00 : f32
    %22 = vector.broadcast %cst_7 : f32 to vector<8x1xf32>
    %23 = arith.maximumf %21, %22 : vector<8x1xf32>
    %cst_8 = arith.constant 0.000000e+00 : f32
    %24 = vector.broadcast %cst_8 : f32 to vector<8x1xf32>
    %25 = arith.subf %24, %23 : vector<8x1xf32>
    %26 = math.exp %25 : vector<8x1xf32>
    %cst_9 = arith.constant 1.000000e+00 : f32
    %27 = vector.broadcast %cst_9 : f32 to vector<8x1xf32>
    %28 = arith.subf %27, %26 : vector<8x1xf32>
    %cst_10 = arith.constant 0.000000e+00 : f32
    %29 = vector.broadcast %cst_10 : f32 to vector<8x1xf32>
    %30 = arith.maximumf %28, %29 : vector<8x1xf32>
    %31 = arith.mulf %30, %30 : vector<8x1xf32>
    %32 = arith.mulf %31, %23 : vector<8x1xf32>
    %c1_i32 = arith.constant 1 : i32
    %33 = arith.muli %arg0, %c1_i32 : i32
    %34 = arith.addi %33, %arg1 : i32
    %c8_i32 = arith.constant 8 : i32
    %35 = arith.muli %34, %c8_i32 : i32
    %36 = tpu.iota {dimensions = array<i32: 0>} : vector<8x1xi32>
    %37 = vector.broadcast %35 : i32 to vector<8x1xi32>
    %38 = arith.addi %37, %36 : vector<8x1xi32>
    %c8_i32_11 = arith.constant 8 : i32
    %39 = vector.broadcast %c8_i32_11 : i32 to vector<8x1xi32>
    %40 = arith.cmpi slt, %38, %39 : vector<8x1xi32>
    %cst_12 = arith.constant 0.000000e+00 : f32
    %41 = vector.broadcast %cst_12 : f32 to vector<8x1xf32>
    %42 = arith.select %40, %32, %41 : vector<8x1xi1>, vector<8x1xf32>
    %c0_13 = arith.constant 0 : index
    %c0_14 = arith.constant 0 : index
    %43 = vector.load %arg5[%c0_13, %c0_14] : memref<8x1xf32, #tpu.memory_space<vmem>>, vector<8x1xf32>
    %44 = arith.addf %43, %42 : vector<8x1xf32>
    %c0_15 = arith.constant 0 : index
    %c0_16 = arith.constant 0 : index
    %45 = vector.load %arg5[%c0_15, %c0_16] : memref<8x1xf32, #tpu.memory_space<vmem>>, vector<8x1xf32>
    tpu.vector_store %arg5[%c0_15, %c0_16], %44 {strides = array<i32>} : memref<8x1xf32, #tpu.memory_space<vmem>>, vector<8x1xf32>,
    %c0_i32_17 = arith.constant 0 : i32
    %46 = arith.cmpi eq, %arg1, %c0_i32_17 : i32
    %47 = arith.extui %46 : i1 to i32
    %c0_i32_18 = arith.constant 0 : i32
    %48 = arith.cmpi ne, %47, %c0_i32_18 : i32
    scf.if %48 {
      %cst_19 = arith.constant 0.000000e+00 : f32
      %49 = vector.broadcast %cst_19 : f32 to vector<1x8x128xf32>
      %c0_20 = arith.constant 0 : index
      %c0_21 = arith.constant 0 : index
      %50 = vector.load %arg5[%c0_20, %c0_21] : memref<8x1xf32, #tpu.memory_space<vmem>>, vector<8x1xf32>
      %51 = vector.shape_cast %50 : vector<8x1xf32> to vector<1x8x1xf32>
      %cst_22 = arith.constant dense<0.000000e+00> : vector<1xf32>
      %52 = vector.multi_reduction <add>, %51, %cst_22 [1, 2] : vector<1x8x1xf32> to vector<1xf32>
      %53 = vector.shape_cast %52 : vector<1xf32> to vector<1x1x1xf32>
      %54 = vector.extract %53[0, 0, 0] : f32 from vector<1x1x1xf32>
      %55 = vector.broadcast %54 : f32 to vector<1x8x128xf32>
      %56 = arith.addf %49, %55 : vector<1x8x128xf32>
      %c0_23 = arith.constant 0 : index
      %c0_24 = arith.constant 0 : index
      %c0_25 = arith.constant 0 : index
      %57 = vector.load %arg4[%c0_23, %c0_24, %c0_25] : memref<1x8x128xf32, #tpu.memory_space<vmem>>, vector<1x8x128xf32>
      tpu.vector_store %arg4[%c0_23, %c0_24, %c0_25], %56 {strides = array<i32>} : memref<1x8x128xf32, #tpu.memory_space<vmem>>, vector<1x8x128xf32>,
    } else {
    }
    return
  }
  func.func @transform_0(%arg0: i32, %arg1: i32) -> (i32, i32) {
    %c1_i32 = arith.constant 1 : i32
    %0 = arith.muli %arg0, %c1_i32 : i32
    %1 = arith.addi %0, %arg1 : i32
    %c0_i32 = arith.constant 0 : i32
    %2 = arith.minsi %1, %c0_i32 : i32
    %c0_i32_0 = arith.constant 0 : i32
    %c0_i32_1 = arith.constant 0 : i32
    return %2, %c0_i32_0 : i32, i32
  }
  func.func @transform_1(%arg0: i32, %arg1: i32) -> (i32, i32) {
    %c1_i32 = arith.constant 1 : i32
    %0 = arith.muli %arg0, %c1_i32 : i32
    %1 = arith.addi %0, %arg1 : i32
    %c0_i32 = arith.constant 0 : i32
    %2 = arith.minsi %1, %c0_i32 : i32
    %c0_i32_0 = arith.constant 0 : i32
    %c0_i32_1 = arith.constant 0 : i32
    return %2, %c0_i32_0 : i32, i32
  }
  func.func @transform_2(%arg0: i32, %arg1: i32) -> (i32, i32, i32) {
    %c0_i32 = arith.constant 0 : i32
    %c0_i32_0 = arith.constant 0 : i32
    %c0_i32_1 = arith.constant 0 : i32
    return %arg0, %c0_i32, %c0_i32_0 : i32, i32, i32
  }
}

</mosaic_0001>

<bundles_post_ra>
// kernel: tpu_custom_call.1
= control target key start
LH: loop header
LB: loop body
LE: loop exit
PB: predicated region body
PF: predicated region fallthrough
CT: control target
= control target key end

     0   :  { %vm81_vm0 = vcmask 261120   ;;  %s234_s0 = inlined_call_operand.vmem [shape: f32[8,32], index: 0, kind: input, shape index: {}]   ;;  %s235_s1 = inlined_call_operand.vmem [shape: s32[8,1], index: 1, kind: input, shape index: {}]   ;;  %s236_s2 = inlined_call_operand.hbm [shape: f32[1,8,128], index: 2, kind: output, shape index: {}]  }
   0x1   :  { %v72_v0 = vld [vmem:[%s234_s0] sm:$0xff] }
   0x2   :  { %7 = vsyncpa [#allocation4], 0  ;;  %v85_v1 = vsel %vm81_vm0, %v72_v0, -inf  ;;  %v201_v2 = vmov 0   ;;  %v73_v3 = vld [vmem:[%s235_s1] sm:$0xff]  ;;  %v74_v9 = vlaneseq  ;;  %vm70_vm2 = vcmask 7168  }
   0x3   :  { %168 = vset.pattern.permute.xlu0 %v201_v2  ;;  %v202_v14 = vmov 0.0   ;;  %s203_s0 = smov [#allocation3]   ;;  %s142_s15 = sshll.u32 %s236_s2, 4  ;;  %s143_s15 = int_to_ptr.hbm [resolvable:$true] %s142_s15 }
   0x4   :  { %86 = vmax.xlane.f32.xlu0 %v85_v1  ;;  %v75_v10 = vand.u32 127, %v74_v9  ;;  %71 = vst.msk [vmem:[#allocation2] sm:$0xff] %vm70_vm2, %v202_v14  ;;  %s140_s1 = sshll.u32 %s203_s0, 4  ;;  %s141_s1 = int_to_ptr.vmem [resolvable:$true] %s140_s1 }
   0xb   :  { %v114_v28 = vld [vmem:[#allocation2] sm:$0xff] }
  0x18   :  { %77 = vperm.xlu0 %168, %v73_v3  }
  0x77   :  { %v87_v4 = vpop.xlane.xlu0 %86 }
  0x78   :  { %v88_v5 = vsub.f32 %v72_v0, %v87_v4 }
  0x7a   :  { %v89_v6 = vmul.f32 1.442695, %v88_v5 }
  0x7c   :  { %169 = vpow2.f32 %v89_v6 }
  0x82   :  { %v170_v7 = vpop.eup %169 }
  0x83   :  { %v91_v8 = vsel %vm81_vm0, %v170_v7, 0.0 }
  0x84   :  { %92 = vadd.xlane.f32.xlu1 %v91_v8 }
  0x8a   :  { %v78_v11 = vpop.permute.xlu0 %77 }
  0x8b   :  { %vm79_vm1 = vcmp.eq.s32.totalorder %v75_v10, %v78_v11 }
  0x8c   :  { %v80_v12 = vsel %vm79_vm1, %v72_v0, 0.0 }
  0x8d   :  { %v82_v13 = vsel %vm81_vm0, %v80_v12, 0.0 }
  0x8e   :  { %83 = vadd.xlane.f32.xlu1 %v82_v13 }
  0xf7   :  { %v93_v15 = vpop.xlane.xlu1 %92 }
  0xf8   :  { %171 = vlog2.f32 %v93_v15 }
  0xfe   :  { %v172_v16 = vpop.eup %171 }
  0xff   :  { %v95_v18 = vmul.f32 0.6931472, %v172_v16 }
 0x101   :  { %v84_v17 = vpop.xlane.xlu1 %83 }
 0x102   :  { %v96_v19 = vsub.f32 %v84_v17, %v87_v4 }
 0x104   :  { %v97_v20 = vsub.f32 %v95_v18, %v96_v19 }
 0x106   :  { %v98_v21 = vmax.f32 %v97_v20, 0.0 }
 0x108   :  { %v99_v22 = vsub.f32 0.0, %v98_v21 }
 0x10a   :  { %v100_v23 = vmul.f32 1.442695, %v99_v22 }
 0x10c   :  { %173 = vpow2.f32 %v100_v23 }
 0x112   :  { %v174_v24 = vpop.eup %173 }
 0x113   :  { %v102_v25 = vsub.f32 1.0, %v174_v24 }
 0x115   :  { %v103_v26 = vmax.f32 %v102_v25, 0.0 }
 0x117   :  { %v104_v27 = vmul.f32 %v103_v26, %v103_v26 }
 0x119   :  { %v105_v29 = vmul.f32 %v104_v27, %v98_v21 }
 0x11b   :  { %v115_v30 = vadd.f32 %v114_v28, %v105_v29 }
 0x11d   :  { %117 = vst.msk [vmem:[#allocation2] sm:$0xff] %vm70_vm2, %v115_v30 }
 0x124   :  { %v121_v31 = vld [vmem:[#allocation2] sm:$0xff] }
 0x125   :  { %v122_v32 = vsel %vm70_vm2, %v121_v31, 0.0 }
 0x126   :  { %123 = vadd.xlane.f32.xlu2 %v122_v32 }
 0x199   :  { %v124_v33 = vpop.xlane.xlu2 %123 }
 0x19a   :  { %v125_v34 = vrot.slane %v124_v33, 4 }
 0x19c   :  { %v126_v35 = vadd.f32 %v125_v34, %v124_v33 }
 0x19e   :  { %v127_v36 = vrot.slane %v126_v35, 2 }
 0x1a0   :  { %v128_v37 = vadd.f32 %v127_v36, %v126_v35 }
 0x1a2   :  { %v129_v38 = vrot.slane %v128_v37, 1 }
 0x1a4   :  { %v130_v39 = vadd.f32 %v129_v38, %v128_v37 }
 0x1a6   :  { %163 = vpush %v130_v39 }
 0x1d7   :  { %s164_s16 = spop %163 }
 0x1d8   :  { %v132_v40 = vstv %s164_s16 }
 0x1d9   :  { %134 = vst [vmem:[#allocation3] sm:$0xff] %v132_v40 }
 0x1da   :  { %145 = dma.vmem_to_hbm [thread:$0]  %s141_s1, 128, %s143_s15, [#allocation4]  }
 0x1db   :  { %199 = dma.done.wait [#allocation4], 128  }
 0x1dc   :  { %200 = vsyncadd [#allocation4], 4294967168 }
 0x1dd   :  { %150 = vsyncpa [#allocation4], 1 }

</bundles_post_ra>
